<compile_context>
chip_gen: v7x
topology: tpu7x:2x2x1
jax: 0.10.0
libtpu: 0.0.40
codegen_flags: <defaults>
</compile_context>

<pallas_src>
import functools

import jax
import jax.numpy as jnp
import numpy as np
from jax.experimental import pallas as pl
from jax.experimental.pallas import tpu as pltpu

IGNORE_LABEL = 10
_EPS = 1e-12


def _row_to_col(label_row, q):
    """(1, q) lane-layout int32 labels -> (q, 1) sublane column.

    Uses sublane-broadcast + 2-D iota + lane reduction (all well-supported
    vector ops) instead of a lane->sublane reshape/transpose relayout.
    """
    lbl_b = jnp.broadcast_to(label_row, (q, q))                  # (q, q)
    r = jax.lax.broadcasted_iota(jnp.int32, (q, q), 0)
    c = jax.lax.broadcasted_iota(jnp.int32, (q, q), 1)
    picked = jnp.where(r == c, lbl_b, 0)                         # diagonal
    return jnp.sum(picked, axis=1, keepdims=True)                # (q, 1)


def _modal_partials(feats, label_row, centers_ref, num_classes):
    """Per-modality partial sums.

    Returns (sum of per-row L2 norms [scalar],
             sum over rows of normalized diffs [(1, D)]).
    Rows with label == IGNORE_LABEL contribute exactly zero.
    """
    q, _ = feats.shape
    lbl_col = _row_to_col(label_row, q)                          # (q, 1) i32
    live = (lbl_col != IGNORE_LABEL).astype(jnp.float32)         # (q, 1)

    # VPU select-accumulate gather of centers[label]; ignored labels match no
    # class and produce an all-zero gathered row.
    gathered = jnp.zeros_like(feats)
    for cls in range(num_classes):
        crow = centers_ref[cls:cls + 1, :]                       # (1, D)
        gathered = gathered + jnp.where(lbl_col == cls, crow, 0.0)

    diff = (feats - gathered) * live                             # masked -> 0
    sumsq = jnp.sum(diff * diff, axis=1, keepdims=True)          # (q, 1)

    # rsqrt on the narrow column (EUP slot).  Masked rows see rsqrt(~1)=~1 and
    # contribute zero; _EPS guards the degenerate live-row zero-diff case.
    inv = jax.lax.rsqrt(sumsq + (1.0 - live) + _EPS)             # (q, 1)
    norms = sumsq * inv                    # = sqrt(sumsq) on live rows, 0 else
    normalized = diff * inv                                      # (q, D)

    return jnp.sum(norms), jnp.sum(normalized, axis=0, keepdims=True)


def _center_loss_kernel(centers_ref, lbl2d_ref, lbl3d_ref, img_ref, pts_ref,
                        loss_ref, *, num_queries, num_classes, center_denom):
    img = img_ref[0]                                             # (Q, D)
    pts = pts_ref[0]                                             # (Q3, D)

    n_img, s_img = _modal_partials(img, lbl2d_ref[...], centers_ref,
                                   num_classes)
    n_pts, s_pts = _modal_partials(pts, lbl3d_ref[...], centers_ref,
                                   num_classes)

    # ---- center loss ----
    loss_center = (n_img + n_pts) / center_denom * 10.0

    # ---- geometric-median loss ----
    s = s_img + s_pts                                            # (1, D)
    loss_geomed = jnp.sum(s * s) / float(num_queries) * 3.0

    # ---- separation loss (mean-centered closed form) ----
    # sum_{i<j} ||ci - cj||^2 = C * sum_i ||ci - mean(c)||^2
    centers = centers_ref[...]                                   # (C, D)
    centered = centers - jnp.mean(centers, axis=0, keepdims=True)
    tri_sum = float(num_classes) * jnp.sum(centered * centered)
    loss_sep = (-0.1 * tri_sum) / float(num_queries) / 7.0

    loss_ref[0] = loss_center
    loss_ref[1] = loss_geomed
    loss_ref[2] = loss_sep


def cross_modal_center_loss(gt_labels_2d, gt_labels_3d, img_feats, pts_feats,
                            centers):
    """JAX/Pallas equivalent of CrossModalCenterLoss.forward.

    gt_labels_2d: (1, Q) int
    gt_labels_3d: (1, Q3) int (torch slices to [:200])
    img_feats:    (1, Q, D) float32
    pts_feats:    (1, Q3', D) float32
    centers:      (num_classes, D) float32
    """
    num_queries = img_feats.shape[1]
    feat_dim = img_feats.shape[2]
    num_classes = centers.shape[0]

    # Torch slices the 3D labels to [:200]; only materialize the slice when it
    # actually shortens the array (zero extra HLOs in the common case).
    n3 = min(200, gt_labels_3d.shape[1])
    if gt_labels_3d.shape[1] != n3:
        gt_labels_3d = gt_labels_3d[:, :n3]
    assert n3 == pts_feats.shape[1], \
        "3D labels (after [:200]) must match pts_feats rows"

    # astype only when needed (no-op HLO-wise for already-int32 inputs).
    if gt_labels_2d.dtype != jnp.int32:
        gt_labels_2d = gt_labels_2d.astype(jnp.int32)
    if gt_labels_3d.dtype != jnp.int32:
        gt_labels_3d = gt_labels_3d.astype(jnp.int32)

    kernel = functools.partial(
        _center_loss_kernel,
        num_queries=num_queries,
        num_classes=num_classes,
        center_denom=200.0,   # _calculate_center_loss uses num_queries=200
    )

    vmem = pl.BlockSpec(memory_space=pltpu.MemorySpace.VMEM)
    smem_out = pl.BlockSpec(memory_space=pltpu.MemorySpace.SMEM)

    n_rows = num_queries + n3
    cost = pl.CostEstimate(
        flops=(2 * n_rows * num_classes * feat_dim
               + 12 * n_rows * feat_dim
               + 4 * num_classes * feat_dim),
        transcendentals=n_rows,
        bytes_accessed=4 * (n_rows * feat_dim + num_classes * feat_dim
                            + num_queries + n3 + 3),
    )

    losses = pl.pallas_call(
        kernel,
        out_shape=jax.ShapeDtypeStruct((3,), jnp.float32),
        in_specs=[vmem, vmem, vmem, vmem, vmem],
        out_specs=smem_out,
        cost_estimate=cost,
    )(centers, gt_labels_2d, gt_labels_3d, img_feats, pts_feats)

    return losses[0], losses[1], losses[2]


def _numpy_reference(gt_labels_2d, gt_labels_3d, img_feats, pts_feats, centers):
    """Direct numpy transcription of the torch forward (for verification)."""
    centers = np.asarray(centers, np.float64)
    num_queries = img_feats.shape[1]
    img = np.asarray(img_feats, np.float64).reshape(num_queries, -1)
    pts = np.asarray(pts_feats, np.float64).reshape(pts_feats.shape[1], -1)
    l2d = np.asarray(gt_labels_2d)[0]
    l3d = np.asarray(gt_labels_3d)[0][:200]

    m2d = l2d != IGNORE_LABEL
    m3d = l3d != IGNORE_LABEL
    img_m = img[m2d]
    pts_m = pts[m3d]
    c2d = centers[l2d[m2d]]
    c3d = centers[l3d[m3d]]

    n_img = np.linalg.norm(img_m - c2d, axis=1)
    n_pts = np.linalg.norm(pts_m - c3d, axis=1)
    loss_center = (n_img.sum() + n_pts.sum()) / 200.0 * 10.0

    ni = (img_m - c2d) / n_img[:, None]
    npts = (pts_m - c3d) / n_pts[:, None]
    s = ni.sum(0) + npts.sum(0)
    loss_geomed = np.linalg.norm(s) ** 2 / num_queries * 3.0

    c1 = centers[:, None, :]
    c2 = centers[None, :, :]
    d2 = ((c1 - c2) ** 2).sum(-1)
    tri = np.triu(d2, 1).sum()
    loss_sep = -0.1 * tri / num_queries / 7.0
    return loss_center, loss_geomed, loss_sep


if __name__ == "__main__":
    NUM_CLASSES = 10
    FEAT_DIM = 128   # feat_dim=128 is hard-coded in _calculate_separate_loss
    Q = 16           # small num_queries (<= 200)

    key = jax.random.PRNGKey(0)
    k_centers, k_img, k_pts, k_l2d, k_l3d = jax.random.split(key, 5)

    # nn.Parameter(torch.randn(num_classes, feat_dim)) -> deterministic normal
    centers = jax.random.normal(k_centers, (NUM_CLASSES, FEAT_DIM), jnp.float32)

    img_feats = jax.random.normal(k_img, (1, Q, FEAT_DIM), jnp.float32)
    pts_feats = jax.random.normal(k_pts, (1, Q, FEAT_DIM), jnp.float32)
    # labels in [0, 10]; value 10 means "ignore"
    gt_labels_2d = jax.random.randint(k_l2d, (1, Q), 0, NUM_CLASSES + 1, jnp.int32)
    gt_labels_3d = jax.random.randint(k_l3d, (1, Q), 0, NUM_CLASSES + 1, jnp.int32)

    loss_center, loss_geomed, loss_sep = jax.block_until_ready(
        cross_modal_center_loss(gt_labels_2d, gt_labels_3d,
                                img_feats, pts_feats, centers))

    ref_c, ref_g, ref_s = _numpy_reference(gt_labels_2d, gt_labels_3d,
                                           img_feats, pts_feats, centers)
    np.testing.assert_allclose(float(loss_center), ref_c, rtol=1e-4, atol=1e-4)
    np.testing.assert_allclose(float(loss_geomed), ref_g, rtol=1e-4, atol=1e-4)
    np.testing.assert_allclose(float(loss_sep), ref_s, rtol=1e-4, atol=1e-4)

    print("KERNEL_OK")
</pallas_src>

<mosaic_0001>
module attributes {stable_mosaic.version = 11 : i64} {
  func.func @_center_loss_kernel(%arg0: memref<10x128xf32, #tpu.memory_space<vmem>>, %arg1: memref<1x16xi32, #tpu.memory_space<vmem>>, %arg2: memref<1x16xi32, #tpu.memory_space<vmem>>, %arg3: memref<1x16x128xf32, #tpu.memory_space<vmem>>, %arg4: memref<1x16x128xf32, #tpu.memory_space<vmem>>, %arg5: memref<3xf32, #tpu.memory_space<smem>>) attributes {dimension_semantics = [], scalar_prefetch = 0 : i64, scratch_operands = 0 : i64, tpu.core_type = #tpu.core_type<tc>} {
    %c0 = arith.constant 0 : index
    %c0_0 = arith.constant 0 : index
    %c0_1 = arith.constant 0 : index
    %0 = vector.load %arg3[%c0, %c0_0, %c0_1] : memref<1x16x128xf32, #tpu.memory_space<vmem>>, vector<1x16x128xf32>
    %1 = vector.shape_cast %0 : vector<1x16x128xf32> to vector<16x128xf32>
    %c0_2 = arith.constant 0 : index
    %c0_3 = arith.constant 0 : index
    %c0_4 = arith.constant 0 : index
    %2 = vector.load %arg4[%c0_2, %c0_3, %c0_4] : memref<1x16x128xf32, #tpu.memory_space<vmem>>, vector<1x16x128xf32>
    %3 = vector.shape_cast %2 : vector<1x16x128xf32> to vector<16x128xf32>
    %c0_5 = arith.constant 0 : index
    %c0_6 = arith.constant 0 : index
    %4 = vector.load %arg1[%c0_5, %c0_6] : memref<1x16xi32, #tpu.memory_space<vmem>>, vector<1x16xi32>
    %5 = vector.shape_cast %4 : vector<1x16xi32> to vector<1x16xi32>
    %6 = vector.broadcast %5 : vector<1x16xi32> to vector<16x16xi32>
    %7 = tpu.iota {dimensions = array<i32: 0>} : vector<16x16xi32>
    %8 = tpu.iota {dimensions = array<i32: 1>} : vector<16x16xi32>
    %9 = arith.cmpi eq, %7, %8 : vector<16x16xi32>
    %c0_i32 = arith.constant 0 : i32
    %10 = vector.broadcast %c0_i32 : i32 to vector<16x16xi32>
    %11 = arith.select %9, %6, %10 : vector<16x16xi1>, vector<16x16xi32>
    %cst = arith.constant dense<0> : vector<16xi32>
    %12 = vector.multi_reduction <add>, %11, %cst [1] : vector<16x16xi32> to vector<16xi32>
    %13 = vector.shape_cast %12 : vector<16xi32> to vector<16x1xi32>
    %c10_i32 = arith.constant 10 : i32
    %14 = vector.broadcast %c10_i32 : i32 to vector<16x1xi32>
    %15 = arith.cmpi ne, %13, %14 : vector<16x1xi32>
    %16 = arith.extui %15 : vector<16x1xi1> to vector<16x1xi32>
    %17 = arith.sitofp %16 : vector<16x1xi32> to vector<16x1xf32>
    %cst_7 = arith.constant 0.000000e+00 : f32
    %18 = vector.broadcast %cst_7 : f32 to vector<16x128xf32>
    %c0_8 = arith.constant 0 : index
    %c0_9 = arith.constant 0 : index
    %19 = vector.load %arg0[%c0_8, %c0_9] : memref<10x128xf32, #tpu.memory_space<vmem>>, vector<1x128xf32>
    %c0_i32_10 = arith.constant 0 : i32
    %20 = vector.broadcast %c0_i32_10 : i32 to vector<16x1xi32>
    %21 = arith.cmpi eq, %13, %20 : vector<16x1xi32>
    %cst_11 = arith.constant 0.000000e+00 : f32
    %22 = vector.shape_cast %21 : vector<16x1xi1> to vector<16x1xi1>
    %23 = vector.broadcast %22 : vector<16x1xi1> to vector<16x128xi1>
    %24 = vector.shape_cast %19 : vector<1x128xf32> to vector<1x128xf32>
    %25 = vector.broadcast %24 : vector<1x128xf32> to vector<16x128xf32>
    %26 = vector.broadcast %cst_11 : f32 to vector<16x128xf32>
    %27 = arith.select %23, %25, %26 : vector<16x128xi1>, vector<16x128xf32>
    %28 = arith.addf %18, %27 : vector<16x128xf32>
    %c1 = arith.constant 1 : index
    %c0_12 = arith.constant 0 : index
    %29 = vector.load %arg0[%c1, %c0_12] : memref<10x128xf32, #tpu.memory_space<vmem>>, vector<1x128xf32>
    %c1_i32 = arith.constant 1 : i32
    %30 = vector.broadcast %c1_i32 : i32 to vector<16x1xi32>
    %31 = arith.cmpi eq, %13, %30 : vector<16x1xi32>
    %cst_13 = arith.constant 0.000000e+00 : f32
    %32 = vector.shape_cast %31 : vector<16x1xi1> to vector<16x1xi1>
    %33 = vector.broadcast %32 : vector<16x1xi1> to vector<16x128xi1>
    %34 = vector.shape_cast %29 : vector<1x128xf32> to vector<1x128xf32>
    %35 = vector.broadcast %34 : vector<1x128xf32> to vector<16x128xf32>
    %36 = vector.broadcast %cst_13 : f32 to vector<16x128xf32>
    %37 = arith.select %33, %35, %36 : vector<16x128xi1>, vector<16x128xf32>
    %38 = arith.addf %28, %37 : vector<16x128xf32>
    %c2 = arith.constant 2 : index
    %c0_14 = arith.constant 0 : index
    %39 = vector.load %arg0[%c2, %c0_14] : memref<10x128xf32, #tpu.memory_space<vmem>>, vector<1x128xf32>
    %c2_i32 = arith.constant 2 : i32
    %40 = vector.broadcast %c2_i32 : i32 to vector<16x1xi32>
    %41 = arith.cmpi eq, %13, %40 : vector<16x1xi32>
    %cst_15 = arith.constant 0.000000e+00 : f32
    %42 = vector.shape_cast %41 : vector<16x1xi1> to vector<16x1xi1>
    %43 = vector.broadcast %42 : vector<16x1xi1> to vector<16x128xi1>
    %44 = vector.shape_cast %39 : vector<1x128xf32> to vector<1x128xf32>
    %45 = vector.broadcast %44 : vector<1x128xf32> to vector<16x128xf32>
    %46 = vector.broadcast %cst_15 : f32 to vector<16x128xf32>
    %47 = arith.select %43, %45, %46 : vector<16x128xi1>, vector<16x128xf32>
    %48 = arith.addf %38, %47 : vector<16x128xf32>
    %c3 = arith.constant 3 : index
    %c0_16 = arith.constant 0 : index
    %49 = vector.load %arg0[%c3, %c0_16] : memref<10x128xf32, #tpu.memory_space<vmem>>, vector<1x128xf32>
    %c3_i32 = arith.constant 3 : i32
    %50 = vector.broadcast %c3_i32 : i32 to vector<16x1xi32>
    %51 = arith.cmpi eq, %13, %50 : vector<16x1xi32>
    %cst_17 = arith.constant 0.000000e+00 : f32
    %52 = vector.shape_cast %51 : vector<16x1xi1> to vector<16x1xi1>
    %53 = vector.broadcast %52 : vector<16x1xi1> to vector<16x128xi1>
    %54 = vector.shape_cast %49 : vector<1x128xf32> to vector<1x128xf32>
    %55 = vector.broadcast %54 : vector<1x128xf32> to vector<16x128xf32>
    %56 = vector.broadcast %cst_17 : f32 to vector<16x128xf32>
    %57 = arith.select %53, %55, %56 : vector<16x128xi1>, vector<16x128xf32>
    %58 = arith.addf %48, %57 : vector<16x128xf32>
    %c4 = arith.constant 4 : index
    %c0_18 = arith.constant 0 : index
    %59 = vector.load %arg0[%c4, %c0_18] : memref<10x128xf32, #tpu.memory_space<vmem>>, vector<1x128xf32>
    %c4_i32 = arith.constant 4 : i32
    %60 = vector.broadcast %c4_i32 : i32 to vector<16x1xi32>
    %61 = arith.cmpi eq, %13, %60 : vector<16x1xi32>
    %cst_19 = arith.constant 0.000000e+00 : f32
    %62 = vector.shape_cast %61 : vector<16x1xi1> to vector<16x1xi1>
    %63 = vector.broadcast %62 : vector<16x1xi1> to vector<16x128xi1>
    %64 = vector.shape_cast %59 : vector<1x128xf32> to vector<1x128xf32>
    %65 = vector.broadcast %64 : vector<1x128xf32> to vector<16x128xf32>
    %66 = vector.broadcast %cst_19 : f32 to vector<16x128xf32>
    %67 = arith.select %63, %65, %66 : vector<16x128xi1>, vector<16x128xf32>
    %68 = arith.addf %58, %67 : vector<16x128xf32>
    %c5 = arith.constant 5 : index
    %c0_20 = arith.constant 0 : index
    %69 = vector.load %arg0[%c5, %c0_20] : memref<10x128xf32, #tpu.memory_space<vmem>>, vector<1x128xf32>
    %c5_i32 = arith.constant 5 : i32
    %70 = vector.broadcast %c5_i32 : i32 to vector<16x1xi32>
    %71 = arith.cmpi eq, %13, %70 : vector<16x1xi32>
    %cst_21 = arith.constant 0.000000e+00 : f32
    %72 = vector.shape_cast %71 : vector<16x1xi1> to vector<16x1xi1>
    %73 = vector.broadcast %72 : vector<16x1xi1> to vector<16x128xi1>
    %74 = vector.shape_cast %69 : vector<1x128xf32> to vector<1x128xf32>
    %75 = vector.broadcast %74 : vector<1x128xf32> to vector<16x128xf32>
    %76 = vector.broadcast %cst_21 : f32 to vector<16x128xf32>
    %77 = arith.select %73, %75, %76 : vector<16x128xi1>, vector<16x128xf32>
    %78 = arith.addf %68, %77 : vector<16x128xf32>
    %c6 = arith.constant 6 : index
    %c0_22 = arith.constant 0 : index
    %79 = vector.load %arg0[%c6, %c0_22] : memref<10x128xf32, #tpu.memory_space<vmem>>, vector<1x128xf32>
    %c6_i32 = arith.constant 6 : i32
    %80 = vector.broadcast %c6_i32 : i32 to vector<16x1xi32>
    %81 = arith.cmpi eq, %13, %80 : vector<16x1xi32>
    %cst_23 = arith.constant 0.000000e+00 : f32
    %82 = vector.shape_cast %81 : vector<16x1xi1> to vector<16x1xi1>
    %83 = vector.broadcast %82 : vector<16x1xi1> to vector<16x128xi1>
    %84 = vector.shape_cast %79 : vector<1x128xf32> to vector<1x128xf32>
    %85 = vector.broadcast %84 : vector<1x128xf32> to vector<16x128xf32>
    %86 = vector.broadcast %cst_23 : f32 to vector<16x128xf32>
    %87 = arith.select %83, %85, %86 : vector<16x128xi1>, vector<16x128xf32>
    %88 = arith.addf %78, %87 : vector<16x128xf32>
    %c7 = arith.constant 7 : index
    %c0_24 = arith.constant 0 : index
    %89 = vector.load %arg0[%c7, %c0_24] : memref<10x128xf32, #tpu.memory_space<vmem>>, vector<1x128xf32>
    %c7_i32 = arith.constant 7 : i32
    %90 = vector.broadcast %c7_i32 : i32 to vector<16x1xi32>
    %91 = arith.cmpi eq, %13, %90 : vector<16x1xi32>
    %cst_25 = arith.constant 0.000000e+00 : f32
    %92 = vector.shape_cast %91 : vector<16x1xi1> to vector<16x1xi1>
    %93 = vector.broadcast %92 : vector<16x1xi1> to vector<16x128xi1>
    %94 = vector.shape_cast %89 : vector<1x128xf32> to vector<1x128xf32>
    %95 = vector.broadcast %94 : vector<1x128xf32> to vector<16x128xf32>
    %96 = vector.broadcast %cst_25 : f32 to vector<16x128xf32>
    %97 = arith.select %93, %95, %96 : vector<16x128xi1>, vector<16x128xf32>
    %98 = arith.addf %88, %97 : vector<16x128xf32>
    %c8 = arith.constant 8 : index
    %c0_26 = arith.constant 0 : index
    %99 = vector.load %arg0[%c8, %c0_26] : memref<10x128xf32, #tpu.memory_space<vmem>>, vector<1x128xf32>
    %c8_i32 = arith.constant 8 : i32
    %100 = vector.broadcast %c8_i32 : i32 to vector<16x1xi32>
    %101 = arith.cmpi eq, %13, %100 : vector<16x1xi32>
    %cst_27 = arith.constant 0.000000e+00 : f32
    %102 = vector.shape_cast %101 : vector<16x1xi1> to vector<16x1xi1>
    %103 = vector.broadcast %102 : vector<16x1xi1> to vector<16x128xi1>
    %104 = vector.shape_cast %99 : vector<1x128xf32> to vector<1x128xf32>
    %105 = vector.broadcast %104 : vector<1x128xf32> to vector<16x128xf32>
    %106 = vector.broadcast %cst_27 : f32 to vector<16x128xf32>
    %107 = arith.select %103, %105, %106 : vector<16x128xi1>, vector<16x128xf32>
    %108 = arith.addf %98, %107 : vector<16x128xf32>
    %c9 = arith.constant 9 : index
    %c0_28 = arith.constant 0 : index
    %109 = vector.load %arg0[%c9, %c0_28] : memref<10x128xf32, #tpu.memory_space<vmem>>, vector<1x128xf32>
    %c9_i32 = arith.constant 9 : i32
    %110 = vector.broadcast %c9_i32 : i32 to vector<16x1xi32>
    %111 = arith.cmpi eq, %13, %110 : vector<16x1xi32>
    %cst_29 = arith.constant 0.000000e+00 : f32
    %112 = vector.shape_cast %111 : vector<16x1xi1> to vector<16x1xi1>
    %113 = vector.broadcast %112 : vector<16x1xi1> to vector<16x128xi1>
    %114 = vector.shape_cast %109 : vector<1x128xf32> to vector<1x128xf32>
    %115 = vector.broadcast %114 : vector<1x128xf32> to vector<16x128xf32>
    %116 = vector.broadcast %cst_29 : f32 to vector<16x128xf32>
    %117 = arith.select %113, %115, %116 : vector<16x128xi1>, vector<16x128xf32>
    %118 = arith.addf %108, %117 : vector<16x128xf32>
    %119 = arith.subf %1, %118 : vector<16x128xf32>
    %120 = vector.broadcast %17 : vector<16x1xf32> to vector<16x128xf32>
    %121 = arith.mulf %119, %120 : vector<16x128xf32>
    %122 = arith.mulf %121, %121 : vector<16x128xf32>
    %cst_30 = arith.constant dense<0.000000e+00> : vector<16xf32>
    %123 = vector.multi_reduction <add>, %122, %cst_30 [1] : vector<16x128xf32> to vector<16xf32>
    %124 = vector.shape_cast %123 : vector<16xf32> to vector<16x1xf32>
    %cst_31 = arith.constant 1.000000e+00 : f32
    %125 = vector.broadcast %cst_31 : f32 to vector<16x1xf32>
    %126 = arith.subf %125, %17 : vector<16x1xf32>
    %127 = arith.addf %124, %126 : vector<16x1xf32>
    %cst_32 = arith.constant 9.99999996E-13 : f32
    %128 = vector.broadcast %cst_32 : f32 to vector<16x1xf32>
    %129 = arith.addf %127, %128 : vector<16x1xf32>
    %130 = math.rsqrt %129 : vector<16x1xf32>
    %131 = arith.mulf %124, %130 : vector<16x1xf32>
    %132 = vector.broadcast %130 : vector<16x1xf32> to vector<16x128xf32>
    %133 = arith.mulf %121, %132 : vector<16x128xf32>
    %134 = vector.shape_cast %131 : vector<16x1xf32> to vector<1x16x1xf32>
    %cst_33 = arith.constant dense<0.000000e+00> : vector<1xf32>
    %135 = vector.multi_reduction <add>, %134, %cst_33 [1, 2] : vector<1x16x1xf32> to vector<1xf32>
    %136 = vector.shape_cast %135 : vector<1xf32> to vector<1x1x1xf32>
    %137 = vector.extract %136[0, 0, 0] : f32 from vector<1x1x1xf32>
    %cst_34 = arith.constant dense<0.000000e+00> : vector<128xf32>
    %138 = vector.multi_reduction <add>, %133, %cst_34 [0] : vector<16x128xf32> to vector<128xf32>
    %139 = vector.shape_cast %138 : vector<128xf32> to vector<1x128xf32>
    %c0_35 = arith.constant 0 : index
    %c0_36 = arith.constant 0 : index
    %140 = vector.load %arg2[%c0_35, %c0_36] : memref<1x16xi32, #tpu.memory_space<vmem>>, vector<1x16xi32>
    %141 = vector.shape_cast %140 : vector<1x16xi32> to vector<1x16xi32>
    %142 = vector.broadcast %141 : vector<1x16xi32> to vector<16x16xi32>
    %143 = tpu.iota {dimensions = array<i32: 0>} : vector<16x16xi32>
    %144 = tpu.iota {dimensions = array<i32: 1>} : vector<16x16xi32>
    %145 = arith.cmpi eq, %143, %144 : vector<16x16xi32>
    %c0_i32_37 = arith.constant 0 : i32
    %146 = vector.broadcast %c0_i32_37 : i32 to vector<16x16xi32>
    %147 = arith.select %145, %142, %146 : vector<16x16xi1>, vector<16x16xi32>
    %cst_38 = arith.constant dense<0> : vector<16xi32>
    %148 = vector.multi_reduction <add>, %147, %cst_38 [1] : vector<16x16xi32> to vector<16xi32>
    %149 = vector.shape_cast %148 : vector<16xi32> to vector<16x1xi32>
    %c10_i32_39 = arith.constant 10 : i32
    %150 = vector.broadcast %c10_i32_39 : i32 to vector<16x1xi32>
    %151 = arith.cmpi ne, %149, %150 : vector<16x1xi32>
    %152 = arith.extui %151 : vector<16x1xi1> to vector<16x1xi32>
    %153 = arith.sitofp %152 : vector<16x1xi32> to vector<16x1xf32>
    %cst_40 = arith.constant 0.000000e+00 : f32
    %154 = vector.broadcast %cst_40 : f32 to vector<16x128xf32>
    %c0_41 = arith.constant 0 : index
    %c0_42 = arith.constant 0 : index
    %155 = vector.load %arg0[%c0_41, %c0_42] : memref<10x128xf32, #tpu.memory_space<vmem>>, vector<1x128xf32>
    %c0_i32_43 = arith.constant 0 : i32
    %156 = vector.broadcast %c0_i32_43 : i32 to vector<16x1xi32>
    %157 = arith.cmpi eq, %149, %156 : vector<16x1xi32>
    %cst_44 = arith.constant 0.000000e+00 : f32
    %158 = vector.shape_cast %157 : vector<16x1xi1> to vector<16x1xi1>
    %159 = vector.broadcast %158 : vector<16x1xi1> to vector<16x128xi1>
    %160 = vector.shape_cast %155 : vector<1x128xf32> to vector<1x128xf32>
    %161 = vector.broadcast %160 : vector<1x128xf32> to vector<16x128xf32>
    %162 = vector.broadcast %cst_44 : f32 to vector<16x128xf32>
    %163 = arith.select %159, %161, %162 : vector<16x128xi1>, vector<16x128xf32>
    %164 = arith.addf %154, %163 : vector<16x128xf32>
    %c1_45 = arith.constant 1 : index
    %c0_46 = arith.constant 0 : index
    %165 = vector.load %arg0[%c1_45, %c0_46] : memref<10x128xf32, #tpu.memory_space<vmem>>, vector<1x128xf32>
    %c1_i32_47 = arith.constant 1 : i32
    %166 = vector.broadcast %c1_i32_47 : i32 to vector<16x1xi32>
    %167 = arith.cmpi eq, %149, %166 : vector<16x1xi32>
    %cst_48 = arith.constant 0.000000e+00 : f32
    %168 = vector.shape_cast %167 : vector<16x1xi1> to vector<16x1xi1>
    %169 = vector.broadcast %168 : vector<16x1xi1> to vector<16x128xi1>
    %170 = vector.shape_cast %165 : vector<1x128xf32> to vector<1x128xf32>
    %171 = vector.broadcast %170 : vector<1x128xf32> to vector<16x128xf32>
    %172 = vector.broadcast %cst_48 : f32 to vector<16x128xf32>
    %173 = arith.select %169, %171, %172 : vector<16x128xi1>, vector<16x128xf32>
    %174 = arith.addf %164, %173 : vector<16x128xf32>
    %c2_49 = arith.constant 2 : index
    %c0_50 = arith.constant 0 : index
    %175 = vector.load %arg0[%c2_49, %c0_50] : memref<10x128xf32, #tpu.memory_space<vmem>>, vector<1x128xf32>
    %c2_i32_51 = arith.constant 2 : i32
    %176 = vector.broadcast %c2_i32_51 : i32 to vector<16x1xi32>
    %177 = arith.cmpi eq, %149, %176 : vector<16x1xi32>
    %cst_52 = arith.constant 0.000000e+00 : f32
    %178 = vector.shape_cast %177 : vector<16x1xi1> to vector<16x1xi1>
    %179 = vector.broadcast %178 : vector<16x1xi1> to vector<16x128xi1>
    %180 = vector.shape_cast %175 : vector<1x128xf32> to vector<1x128xf32>
    %181 = vector.broadcast %180 : vector<1x128xf32> to vector<16x128xf32>
    %182 = vector.broadcast %cst_52 : f32 to vector<16x128xf32>
    %183 = arith.select %179, %181, %182 : vector<16x128xi1>, vector<16x128xf32>
    %184 = arith.addf %174, %183 : vector<16x128xf32>
    %c3_53 = arith.constant 3 : index
    %c0_54 = arith.constant 0 : index
    %185 = vector.load %arg0[%c3_53, %c0_54] : memref<10x128xf32, #tpu.memory_space<vmem>>, vector<1x128xf32>
    %c3_i32_55 = arith.constant 3 : i32
    %186 = vector.broadcast %c3_i32_55 : i32 to vector<16x1xi32>
    %187 = arith.cmpi eq, %149, %186 : vector<16x1xi32>
    %cst_56 = arith.constant 0.000000e+00 : f32
    %188 = vector.shape_cast %187 : vector<16x1xi1> to vector<16x1xi1>
    %189 = vector.broadcast %188 : vector<16x1xi1> to vector<16x128xi1>
    %190 = vector.shape_cast %185 : vector<1x128xf32> to vector<1x128xf32>
    %191 = vector.broadcast %190 : vector<1x128xf32> to vector<16x128xf32>
    %192 = vector.broadcast %cst_56 : f32 to vector<16x128xf32>
    %193 = arith.select %189, %191, %192 : vector<16x128xi1>, vector<16x128xf32>
    %194 = arith.addf %184, %193 : vector<16x128xf32>
    %c4_57 = arith.constant 4 : index
    %c0_58 = arith.constant 0 : index
    %195 = vector.load %arg0[%c4_57, %c0_58] : memref<10x128xf32, #tpu.memory_space<vmem>>, vector<1x128xf32>
    %c4_i32_59 = arith.constant 4 : i32
    %196 = vector.broadcast %c4_i32_59 : i32 to vector<16x1xi32>
    %197 = arith.cmpi eq, %149, %196 : vector<16x1xi32>
    %cst_60 = arith.constant 0.000000e+00 : f32
    %198 = vector.shape_cast %197 : vector<16x1xi1> to vector<16x1xi1>
    %199 = vector.broadcast %198 : vector<16x1xi1> to vector<16x128xi1>
    %200 = vector.shape_cast %195 : vector<1x128xf32> to vector<1x128xf32>
    %201 = vector.broadcast %200 : vector<1x128xf32> to vector<16x128xf32>
    %202 = vector.broadcast %cst_60 : f32 to vector<16x128xf32>
    %203 = arith.select %199, %201, %202 : vector<16x128xi1>, vector<16x128xf32>
    %204 = arith.addf %194, %203 : vector<16x128xf32>
    %c5_61 = arith.constant 5 : index
    %c0_62 = arith.constant 0 : index
    %205 = vector.load %arg0[%c5_61, %c0_62] : memref<10x128xf32, #tpu.memory_space<vmem>>, vector<1x128xf32>
    %c5_i32_63 = arith.constant 5 : i32
    %206 = vector.broadcast %c5_i32_63 : i32 to vector<16x1xi32>
    %207 = arith.cmpi eq, %149, %206 : vector<16x1xi32>
    %cst_64 = arith.constant 0.000000e+00 : f32
    %208 = vector.shape_cast %207 : vector<16x1xi1> to vector<16x1xi1>
    %209 = vector.broadcast %208 : vector<16x1xi1> to vector<16x128xi1>
    %210 = vector.shape_cast %205 : vector<1x128xf32> to vector<1x128xf32>
    %211 = vector.broadcast %210 : vector<1x128xf32> to vector<16x128xf32>
    %212 = vector.broadcast %cst_64 : f32 to vector<16x128xf32>
    %213 = arith.select %209, %211, %212 : vector<16x128xi1>, vector<16x128xf32>
    %214 = arith.addf %204, %213 : vector<16x128xf32>
    %c6_65 = arith.constant 6 : index
    %c0_66 = arith.constant 0 : index
    %215 = vector.load %arg0[%c6_65, %c0_66] : memref<10x128xf32, #tpu.memory_space<vmem>>, vector<1x128xf32>
    %c6_i32_67 = arith.constant 6 : i32
    %216 = vector.broadcast %c6_i32_67 : i32 to vector<16x1xi32>
    %217 = arith.cmpi eq, %149, %216 : vector<16x1xi32>
    %cst_68 = arith.constant 0.000000e+00 : f32
    %218 = vector.shape_cast %217 : vector<16x1xi1> to vector<16x1xi1>
    %219 = vector.broadcast %218 : vector<16x1xi1> to vector<16x128xi1>
    %220 = vector.shape_cast %215 : vector<1x128xf32> to vector<1x128xf32>
    %221 = vector.broadcast %220 : vector<1x128xf32> to vector<16x128xf32>
    %222 = vector.broadcast %cst_68 : f32 to vector<16x128xf32>
    %223 = arith.select %219, %221, %222 : vector<16x128xi1>, vector<16x128xf32>
    %224 = arith.addf %214, %223 : vector<16x128xf32>
    %c7_69 = arith.constant 7 : index
    %c0_70 = arith.constant 0 : index
    %225 = vector.load %arg0[%c7_69, %c0_70] : memref<10x128xf32, #tpu.memory_space<vmem>>, vector<1x128xf32>
    %c7_i32_71 = arith.constant 7 : i32
    %226 = vector.broadcast %c7_i32_71 : i32 to vector<16x1xi32>
    %227 = arith.cmpi eq, %149, %226 : vector<16x1xi32>
    %cst_72 = arith.constant 0.000000e+00 : f32
    %228 = vector.shape_cast %227 : vector<16x1xi1> to vector<16x1xi1>
    %229 = vector.broadcast %228 : vector<16x1xi1> to vector<16x128xi1>
    %230 = vector.shape_cast %225 : vector<1x128xf32> to vector<1x128xf32>
    %231 = vector.broadcast %230 : vector<1x128xf32> to vector<16x128xf32>
    %232 = vector.broadcast %cst_72 : f32 to vector<16x128xf32>
    %233 = arith.select %229, %231, %232 : vector<16x128xi1>, vector<16x128xf32>
    %234 = arith.addf %224, %233 : vector<16x128xf32>
    %c8_73 = arith.constant 8 : index
    %c0_74 = arith.constant 0 : index
    %235 = vector.load %arg0[%c8_73, %c0_74] : memref<10x128xf32, #tpu.memory_space<vmem>>, vector<1x128xf32>
    %c8_i32_75 = arith.constant 8 : i32
    %236 = vector.broadcast %c8_i32_75 : i32 to vector<16x1xi32>
    %237 = arith.cmpi eq, %149, %236 : vector<16x1xi32>
    %cst_76 = arith.constant 0.000000e+00 : f32
    %238 = vector.shape_cast %237 : vector<16x1xi1> to vector<16x1xi1>
    %239 = vector.broadcast %238 : vector<16x1xi1> to vector<16x128xi1>
    %240 = vector.shape_cast %235 : vector<1x128xf32> to vector<1x128xf32>
    %241 = vector.broadcast %240 : vector<1x128xf32> to vector<16x128xf32>
    %242 = vector.broadcast %cst_76 : f32 to vector<16x128xf32>
    %243 = arith.select %239, %241, %242 : vector<16x128xi1>, vector<16x128xf32>
    %244 = arith.addf %234, %243 : vector<16x128xf32>
    %c9_77 = arith.constant 9 : index
    %c0_78 = arith.constant 0 : index
    %245 = vector.load %arg0[%c9_77, %c0_78] : memref<10x128xf32, #tpu.memory_space<vmem>>, vector<1x128xf32>
    %c9_i32_79 = arith.constant 9 : i32
    %246 = vector.broadcast %c9_i32_79 : i32 to vector<16x1xi32>
    %247 = arith.cmpi eq, %149, %246 : vector<16x1xi32>
    %cst_80 = arith.constant 0.000000e+00 : f32
    %248 = vector.shape_cast %247 : vector<16x1xi1> to vector<16x1xi1>
    %249 = vector.broadcast %248 : vector<16x1xi1> to vector<16x128xi1>
    %250 = vector.shape_cast %245 : vector<1x128xf32> to vector<1x128xf32>
    %251 = vector.broadcast %250 : vector<1x128xf32> to vector<16x128xf32>
    %252 = vector.broadcast %cst_80 : f32 to vector<16x128xf32>
    %253 = arith.select %249, %251, %252 : vector<16x128xi1>, vector<16x128xf32>
    %254 = arith.addf %244, %253 : vector<16x128xf32>
    %255 = arith.subf %3, %254 : vector<16x128xf32>
    %256 = vector.broadcast %153 : vector<16x1xf32> to vector<16x128xf32>
    %257 = arith.mulf %255, %256 : vector<16x128xf32>
    %258 = arith.mulf %257, %257 : vector<16x128xf32>
    %cst_81 = arith.constant dense<0.000000e+00> : vector<16xf32>
    %259 = vector.multi_reduction <add>, %258, %cst_81 [1] : vector<16x128xf32> to vector<16xf32>
    %260 = vector.shape_cast %259 : vector<16xf32> to vector<16x1xf32>
    %cst_82 = arith.constant 1.000000e+00 : f32
    %261 = vector.broadcast %cst_82 : f32 to vector<16x1xf32>
    %262 = arith.subf %261, %153 : vector<16x1xf32>
    %263 = arith.addf %260, %262 : vector<16x1xf32>
    %cst_83 = arith.constant 9.99999996E-13 : f32
    %264 = vector.broadcast %cst_83 : f32 to vector<16x1xf32>
    %265 = arith.addf %263, %264 : vector<16x1xf32>
    %266 = math.rsqrt %265 : vector<16x1xf32>
    %267 = arith.mulf %260, %266 : vector<16x1xf32>
    %268 = vector.broadcast %266 : vector<16x1xf32> to vector<16x128xf32>
    %269 = arith.mulf %257, %268 : vector<16x128xf32>
    %270 = vector.shape_cast %267 : vector<16x1xf32> to vector<1x16x1xf32>
    %cst_84 = arith.constant dense<0.000000e+00> : vector<1xf32>
    %271 = vector.multi_reduction <add>, %270, %cst_84 [1, 2] : vector<1x16x1xf32> to vector<1xf32>
    %272 = vector.shape_cast %271 : vector<1xf32> to vector<1x1x1xf32>
    %273 = vector.extract %272[0, 0, 0] : f32 from vector<1x1x1xf32>
    %cst_85 = arith.constant dense<0.000000e+00> : vector<128xf32>
    %274 = vector.multi_reduction <add>, %269, %cst_85 [0] : vector<16x128xf32> to vector<128xf32>
    %275 = vector.shape_cast %274 : vector<128xf32> to vector<1x128xf32>
    %276 = arith.addf %137, %273 : f32
    %cst_86 = arith.constant 2.000000e+02 : f32
    %277 = arith.divf %276, %cst_86 : f32
    %cst_87 = arith.constant 1.000000e+01 : f32
    %278 = arith.mulf %277, %cst_87 : f32
    %279 = arith.addf %139, %275 : vector<1x128xf32>
    %280 = arith.mulf %279, %279 : vector<1x128xf32>
    %281 = vector.shape_cast %280 : vector<1x128xf32> to vector<1x1x128xf32>
    %cst_88 = arith.constant dense<0.000000e+00> : vector<1xf32>
    %282 = vector.multi_reduction <add>, %281, %cst_88 [1, 2] : vector<1x1x128xf32> to vector<1xf32>
    %283 = vector.shape_cast %282 : vector<1xf32> to vector<1x1x1xf32>
    %284 = vector.extract %283[0, 0, 0] : f32 from vector<1x1x1xf32>
    %cst_89 = arith.constant 1.600000e+01 : f32
    %285 = arith.divf %284, %cst_89 : f32
    %cst_90 = arith.constant 3.000000e+00 : f32
    %286 = arith.mulf %285, %cst_90 : f32
    %c0_91 = arith.constant 0 : index
    %c0_92 = arith.constant 0 : index
    %287 = vector.load %arg0[%c0_91, %c0_92] : memref<10x128xf32, #tpu.memory_space<vmem>>, vector<10x128xf32>
    %cst_93 = arith.constant dense<0.000000e+00> : vector<128xf32>
    %288 = vector.multi_reduction <add>, %287, %cst_93 [0] : vector<10x128xf32> to vector<128xf32>
    %289 = vector.shape_cast %288 : vector<128xf32> to vector<1x128xf32>
    %cst_94 = arith.constant 1.000000e+01 : f32
    %290 = vector.broadcast %cst_94 : f32 to vector<1x128xf32>
    %291 = arith.divf %289, %290 : vector<1x128xf32>
    %292 = vector.broadcast %291 : vector<1x128xf32> to vector<10x128xf32>
    %293 = arith.subf %287, %292 : vector<10x128xf32>
    %294 = arith.mulf %293, %293 : vector<10x128xf32>
    %295 = vector.shape_cast %294 : vector<10x128xf32> to vector<1x10x128xf32>
    %cst_95 = arith.constant dense<0.000000e+00> : vector<1xf32>
    %296 = vector.multi_reduction <add>, %295, %cst_95 [1, 2] : vector<1x10x128xf32> to vector<1xf32>
    %297 = vector.shape_cast %296 : vector<1xf32> to vector<1x1x1xf32>
    %298 = vector.extract %297[0, 0, 0] : f32 from vector<1x1x1xf32>
    %cst_96 = arith.constant 1.000000e+01 : f32
    %299 = arith.mulf %cst_96, %298 : f32
    %cst_97 = arith.constant -1.000000e-01 : f32
    %300 = arith.mulf %cst_97, %299 : f32
    %cst_98 = arith.constant 1.600000e+01 : f32
    %301 = arith.divf %300, %cst_98 : f32
    %cst_99 = arith.constant 7.000000e+00 : f32
    %302 = arith.divf %301, %cst_99 : f32
    %c0_100 = arith.constant 0 : index
    %303 = memref.load %arg5[%c0_100] : memref<3xf32, #tpu.memory_space<smem>>
    memref.store %278, %arg5[%c0_100] : memref<3xf32, #tpu.memory_space<smem>>
    %c1_101 = arith.constant 1 : index
    %304 = memref.load %arg5[%c1_101] : memref<3xf32, #tpu.memory_space<smem>>
    memref.store %286, %arg5[%c1_101] : memref<3xf32, #tpu.memory_space<smem>>
    %c2_102 = arith.constant 2 : index
    %305 = memref.load %arg5[%c2_102] : memref<3xf32, #tpu.memory_space<smem>>
    memref.store %302, %arg5[%c2_102] : memref<3xf32, #tpu.memory_space<smem>>
    return
  }
}

</mosaic_0001>

<bundles_post_ra>
// kernel: tpu_custom_call.1
= control target key start
LH: loop header
LB: loop body
LE: loop exit
PB: predicated region body
PF: predicated region fallthrough
CT: control target
= control target key end

     0   :  { %10 = vsyncpa [#allocation3], 0  ;;  %s943_s0 = inlined_call_operand.hbm [shape: f32[10,128], index: 0, kind: input, shape index: {}]   ;;  %s944_s1 = inlined_call_operand.vmem [shape: s32[1,16], index: 1, kind: input, shape index: {}]   ;;  %s945_s2 = inlined_call_operand.vmem [shape: s32[1,16], index: 2, kind: input, shape index: {}]   ;;  %s946_s3 = inlined_call_operand.hbm [shape: f32[1,16,128], index: 3, kind: input, shape index: {}]   ;;  %s947_s4 = inlined_call_operand.hbm [shape: f32[1,16,128], index: 4, kind: input, shape index: {}]   ;;  %s948_s5 = inlined_call_operand.hbm [shape: f32[3], index: 5, kind: output, shape index: {}]  }
   0x1   :  { %11 = vsyncpa [#allocation6], 0 }
   0x2   :  { %12 = vsyncpa [#allocation4], 0  ;;  %s685_s18 = smov [#allocation5]   ;;  %s686_s20 = smov [#allocation2]  }
   0x3   :  { %s34_s19 = sshll.u32 %s685_s18, 4  ;;  %s18_s21 = sshll.u32 %s686_s20, 4  ;;  %s35_s19 = int_to_ptr.vmem [resolvable:$true] %s34_s19  ;;  %s722_s21 = int_to_ptr.vmem [resolvable:$true] %s18_s21 }
   0x4   :  { %s603_s24 = scalar_lea.hbm %s946_s3, 256 }
   0x5   :  { %p604_p0 = scmp.ne.s32.totalorder %s946_s3, %s603_s24  ;;  %p607_p1 = scmp.lt.u32.totalorder %s603_s24, %s946_s3 }
   0x7   :  { %p609_p2 = pnand %p607_p1, %p604_p0 }
   0x9   :  { %612 = shalt.err (!%p609_p2)
}
   0xa   :  { %s613_s29 = scalar_lea.vmem %s35_s19, 256  ;;  %p618_p4 = scmp.lt.s32.totalorder %s35_s19, %s35_s19 }
   0xb   :  { %p614_p3 = scmp.ne.s32.totalorder %s35_s19, %s613_s29  ;;  %p619_p5 = scmp.lt.s32.totalorder %s613_s29, %s613_s29 }
   0xd   :  { %p620_p6 = por %p619_p5, %p618_p4 }
   0xf   :  { %p621_p7 = pnand %p620_p6, %p614_p3 }
  0x11   :  { %624 = shalt.err (!%p621_p7)
}
  0x12   :  { %s687_s30 = smov 128   ;;  %s688_s6 = smov 8  }
  0x13   :  { %40 = dma.hbm_to_vmem [thread:$0]  %s946_s3, 256, %s35_s19, [#allocation6], %s687_s30, %s687_s30, %s688_s6  }
  0x14   :  { %s625_s11 = scalar_lea.hbm %s943_s0, 256 }
  0x15   :  { %p626_p8 = scmp.ne.s32.totalorder %s943_s0, %s625_s11  ;;  %p629_p9 = scmp.lt.u32.totalorder %s625_s11, %s943_s0 }
  0x17   :  { %p631_p10 = pnand %p629_p9, %p626_p8 }
  0x19   :  { %634 = shalt.err (!%p631_p10)
}
  0x1a   :  { %s635_s16 = scalar_lea.vmem %s722_s21, 256  ;;  %p640_p12 = scmp.lt.s32.totalorder %s722_s21, %s722_s21 }
  0x1b   :  { %p636_p11 = scmp.ne.s32.totalorder %s722_s21, %s635_s16  ;;  %p641_p13 = scmp.lt.s32.totalorder %s635_s16, %s635_s16 }
  0x1d   :  { %p642_p0 = por %p641_p13, %p640_p12 }
  0x1f   :  { %p643_p1 = pnand %p642_p0, %p636_p11 }
  0x21   :  { %646 = shalt.err (!%p643_p1)
}
  0x22   :  { %24 = dma.hbm_to_vmem [thread:$0]  %s943_s0, 256, %s722_s21, [#allocation3], %s687_s30, %s687_s30, %s688_s6  }
  0x23   :  { %s689_s18 = smov [#allocation7]   ;;  %s647_s23 = scalar_lea.hbm %s947_s4, 256 }
  0x24   :  { %s46_s19 = sshll.u32 %s689_s18, 4  ;;  %p648_p2 = scmp.ne.s32.totalorder %s947_s4, %s647_s23  ;;  %s47_s19 = int_to_ptr.vmem [resolvable:$true] %s46_s19 }
  0x25   :  { %p651_p3 = scmp.lt.u32.totalorder %s647_s23, %s947_s4 }
  0x27   :  { %p653_p4 = pnand %p651_p3, %p648_p2 }
  0x29   :  { %656 = shalt.err (!%p653_p4)
}
  0x2a   :  { %s657_s28 = scalar_lea.vmem %s47_s19, 256  ;;  %p662_p6 = scmp.lt.s32.totalorder %s47_s19, %s47_s19 }
  0x2b   :  { %p658_p5 = scmp.ne.s32.totalorder %s47_s19, %s657_s28  ;;  %p663_p7 = scmp.lt.s32.totalorder %s657_s28, %s657_s28 }
  0x2d   :  { %p664_p8 = por %p663_p7, %p662_p6 }
  0x2f   :  { %p665_p9 = pnand %p664_p8, %p658_p5 }
  0x31   :  { %668 = shalt.err (!%p665_p9)
}
  0x32   :  { %52 = dma.hbm_to_vmem [thread:$0]  %s947_s4, 256, %s47_s19, [#allocation6], %s687_s30, %s687_s30, %s688_s6  }
  0x33   :  { %679 = dma.done.wait [#allocation3], 256  }
  0x34   :  { %680 = vsyncadd [#allocation3], 4294967040 }
  0x35   :  { %681 = dma.done.wait [#allocation6], 512  }
  0x36   :  { %682 = vsyncadd [#allocation6], 4294966784  ;;  %v71_v0 = vlaneseq  ;;  %vm80_vm1 = vcmask 130048   ;;  %v577_v4 = vld [vmem:[%s945_s2] ss:$0 sm:$0xff]  ;;  %s669_s19 = scalar_lea.hbm %s948_s5, 16 }
  0x37   :  { %v564_v5 = vld [vmem:[%s944_s1] ss:$0 sm:$0xff]  ;;  %v784_v45 = vld [vmem:[#allocation2 + $0x1] ss:$0 sm:$0xff]  ;;  %v789_v50 = vld [vmem:[#allocation2 + $0x2] ss:$0 sm:$0xff]  ;;  %p670_p10 = scmp.ne.s32.totalorder %s948_s5, %s669_s19  ;;  %p673_p11 = scmp.lt.u32.totalorder %s669_s19, %s948_s5 }
  0x38   :  { %v72_v1 = vshrl.u32 %v71_v0, 7  ;;  %v75_v2 = vand.u32 127, %v71_v0  ;;  %v782_v41 = vld [vmem:[#allocation2] ss:$0 sm:$0xff]  ;;  %v796_v56 = vld [vmem:[#allocation2 + $0x3] ss:$0 sm:$0xff] }
  0x39   :  { %v800_v60 = vld [vmem:[#allocation2 + $0x4] ss:$0 sm:$0xff]  ;;  %v690_v0 = vmov 0.0   ;;  %p675_p12 = pnand %p673_p11, %p670_p10 }
  0x3a   :  { %v73_v3 = vadd.s32 8, %v72_v1  ;;  %vm76_vm0 = vcmp.eq.s32.totalorder %v72_v1, %v75_v2 }
  0x3b   :  { %v310_v6 = vsel %vm76_vm0, %v577_v4, 0  ;;  %v78_v7 = vsel %vm76_vm0, %v564_v5, 0 }
  0x3c   :  { %vm77_vm2 = vcmp.eq.s32.totalorder %v73_v3, %v75_v2  ;;  %v312_v10 = vsel %vm80_vm1, %v310_v6, 0  ;;  %v81_v11 = vsel %vm80_vm1, %v78_v7, 0  ;;  %v811_v3 = vld [vmem:[#allocation2 + $0x5] ss:$0 sm:$0xff]  ;;  %v815_v6 = vld [vmem:[#allocation2 + $0x6] ss:$0 sm:$0xff] }
  0x3d   :  { %v311_v8 = vsel %vm77_vm2, %v577_v4, 0  ;;  %v79_v9 = vsel %vm77_vm2, %v564_v5, 0  ;;  %v314_v14 = vshrl.u32 %v312_v10, 16  ;;  %v83_v15 = vshrl.u32 %v81_v11, 16  ;;  %v819_v7 = vld [vmem:[#allocation2 + $0x7] ss:$0 sm:$0xff] }
  0x3e   :  { %v325_v12 = vsel %vm80_vm1, %v311_v8, 0  ;;  %v94_v13 = vsel %vm80_vm1, %v79_v9, 0  ;;  %v82_v23 = vand.u32 65535, %v81_v11  ;;  %v313_v27 = vand.u32 65535, %v312_v10  ;;  %v825_v10 = vld [vmem:[#allocation2 + $0x8] ss:$0 sm:$0xff] }
  0x3f   :  { %v327_v16 = vshrl.u32 %v325_v12, 16  ;;  %v96_v17 = vshrl.u32 %v94_v13, 16  ;;  %v316_v18 = vcvt.s32.f32 %v314_v14  ;;  %v85_v19 = vcvt.s32.f32 %v83_v15 }
  0x40   :  { %v95_v22 = vand.u32 65535, %v94_v13  ;;  %v84_v25 = vcvt.s32.f32 %v82_v23  ;;  %v326_v26 = vand.u32 65535, %v325_v12  ;;  %v315_v29 = vcvt.s32.f32 %v313_v27  ;;  %v830_v13 = vld [vmem:[#allocation2 + $0x9] ss:$0 sm:$0xff] }
  0x41   :  { %319 = vadd.xlane.f32.xlu1 %v316_v18  ;;  %88 = vadd.xlane.f32.xlu0 %v85_v19  ;;  %v329_v20 = vcvt.s32.f32 %v327_v16  ;;  %v98_v21 = vcvt.s32.f32 %v96_v17 }
  0x42   :  { %v97_v24 = vcvt.s32.f32 %v95_v22  ;;  %v328_v28 = vcvt.s32.f32 %v326_v26 }
  0x45   :  { %332 = vadd.xlane.f32.xlu1 %v329_v20  ;;  %101 = vadd.xlane.f32.xlu0 %v98_v21 }
  0x49   :  { %99 = vadd.xlane.f32.xlu1 %v97_v24  ;;  %86 = vadd.xlane.f32.xlu0 %v84_v25 }
  0x4d   :  { %330 = vadd.xlane.f32.xlu1 %v328_v28  ;;  %317 = vadd.xlane.f32.xlu0 %v315_v29 }
  0xce   :  { %v320_v30 = vpop.xlane.xlu1 %319  ;;  %v89_v31 = vpop.xlane.xlu0 %88 }
  0xcf   :  { %v91_v39 = vcvt.f32.s32 %v89_v31  ;;  %v322_v46 = vcvt.f32.s32 %v320_v30 }
  0xd1   :  { %v92_v48 = vshll.u32 %v91_v39, 16  ;;  %v323_v57 = vshll.u32 %v322_v46, 16 }
  0xd2   :  { %v333_v32 = vpop.xlane.xlu1 %332  ;;  %v102_v33 = vpop.xlane.xlu0 %101 }
  0xd3   :  { %v104_v34 = vcvt.f32.s32 %v102_v33  ;;  %v335_v47 = vcvt.f32.s32 %v333_v32 }
  0xd5   :  { %v105_v37 = vshll.u32 %v104_v34, 16  ;;  %v336_v58 = vshll.u32 %v335_v47, 16  ;;  %v63_v34 = vld [vmem:[#allocation5 + $0x8] sm:$0xff] }
  0xd6   :  { %v100_v35 = vpop.xlane.xlu1 %99  ;;  %v87_v36 = vpop.xlane.xlu0 %86 }
  0xd7   :  { %v103_v38 = vcvt.f32.s32 %v100_v35  ;;  %v90_v42 = vcvt.f32.s32 %v87_v36 }
  0xd9   :  { %v780_v40 = vadd.s32 %v105_v37, %v103_v38  ;;  %v793_v54 = vadd.s32 %v92_v48, %v90_v42 }
  0xda   :  { %v331_v43 = vpop.xlane.xlu1 %330  ;;  %v318_v44 = vpop.xlane.xlu0 %317 }
  0xdb   :  { %vm115_vm3 = vcmp.eq.s32.totalorder %v780_v40, 0  ;;  %vm130_vm4 = vcmp.eq.s32.totalorder %v780_v40, 1  ;;  %vm145_vm5 = vcmp.eq.s32.totalorder %v780_v40, 2  ;;  %v334_v51 = vcvt.f32.s32 %v331_v43 }
  0xdc   :  { %v125_v49 = vsel %vm115_vm3, %v782_v41, 0.0  ;;  %v321_v52 = vcvt.f32.s32 %v318_v44  ;;  %v140_v53 = vsel %vm130_vm4, %v784_v45, 0.0  ;;  %vm108_vm6 = vcmp.ne.s32.totalorder %v780_v40, 10 }
  0xdd   :  { %v142_v55 = vadd.f32 %v140_v53, %v125_v49  ;;  %vm160_vm7 = vcmp.eq.s32.totalorder %v780_v40, 3  ;;  %v155_v59 = vsel %vm145_vm5, %v789_v50, 0.0  ;;  %vm175_vm8 = vcmp.eq.s32.totalorder %v780_v40, 4 }
  0xde   :  { %v803_v62 = vadd.s32 %v336_v58, %v334_v51  ;;  %v805_v63 = vadd.s32 %v323_v57, %v321_v52  ;;  %v808_v1 = vsel %vm108_vm6, 1.0, %v690_v0  ;;  %v170_v2 = vsel %vm160_vm7, %v796_v56, 0.0 }
  0xdf   :  { %v157_v61 = vadd.f32 %v155_v59, %v142_v55  ;;  %v185_v5 = vsel %vm175_vm8, %v800_v60, 0.0  ;;  %vm190_vm9 = vcmp.eq.s32.totalorder %v780_v40, 5  ;;  %vm114_vm10 = vcmp.eq.s32.totalorder %v793_v54, 0 }
  0xe0   :  { %vm205_vm11 = vcmp.eq.s32.totalorder %v780_v40, 6  ;;  %v124_v8 = vsel %vm114_vm10, %v782_v41, 0.0  ;;  %vm129_vm12 = vcmp.eq.s32.totalorder %v793_v54, 1  ;;  %vm144_vm13 = vcmp.eq.s32.totalorder %v793_v54, 2 }
  0xe1   :  { %v172_v4 = vadd.f32 %v170_v2, %v157_v61  ;;  %vm220_vm14 = vcmp.eq.s32.totalorder %v780_v40, 7  ;;  %vm235_vm15 = vcmp.eq.s32.totalorder %v780_v40, 8  ;;  %v139_v11 = vsel %vm129_vm12, %v784_v45, 0.0 }
  0xe2   :  { %v200_v12 = vsel %vm190_vm9, %v811_v3, 0.0  ;;  %vm250_vm0 = vcmp.eq.s32.totalorder %v780_v40, 9  ;;  %v141_v14 = vadd.f32 %v139_v11, %v124_v8  ;;  %vm159_vm1 = vcmp.eq.s32.totalorder %v793_v54, 3 }
  0xe3   :  { %v187_v9 = vadd.f32 %v185_v5, %v172_v4  ;;  %v215_v16 = vsel %vm205_vm11, %v815_v6, 0.0  ;;  %v154_v17 = vsel %vm144_vm13, %v789_v50, 0.0  ;;  %vm174_vm2 = vcmp.eq.s32.totalorder %v793_v54, 4  ;;  %v62_v4 = vld [vmem:[#allocation5] sm:$0xff] }
  0xe4   :  { %v230_v18 = vsel %vm220_vm14, %v819_v7, 0.0  ;;  %v245_v19 = vsel %vm235_vm15, %v825_v10, 0.0  ;;  %v156_v20 = vadd.f32 %v154_v17, %v141_v14  ;;  %vm189_vm3 = vcmp.eq.s32.totalorder %v793_v54, 5 }
  0xe5   :  { %v202_v15 = vadd.f32 %v200_v12, %v187_v9  ;;  %v260_v22 = vsel %vm250_vm0, %v830_v13, 0.0  ;;  %v169_v23 = vsel %vm159_vm1, %v796_v56, 0.0  ;;  %vm204_vm4 = vcmp.eq.s32.totalorder %v793_v54, 6 }
  0xe6   :  { %v171_v24 = vadd.f32 %v169_v23, %v156_v20  ;;  %v184_v25 = vsel %vm174_vm2, %v800_v60, 0.0  ;;  %vm345_vm5 = vcmp.eq.s32.totalorder %v803_v62, 0  ;;  %vm355_vm6 = vcmp.eq.s32.totalorder %v803_v62, 1 }
  0xe7   :  { %v217_v21 = vadd.f32 %v215_v16, %v202_v15  ;;  %v199_v27 = vsel %vm189_vm3, %v811_v3, 0.0  ;;  %v351_v28 = vsel %vm345_vm5, %v782_v41, 0.0  ;;  %v361_v29 = vsel %vm355_vm6, %v784_v45, 0.0 }
  0xe8   :  { %v186_v30 = vadd.f32 %v184_v25, %v171_v24  ;;  %v363_v31 = vadd.f32 %v361_v29, %v351_v28  ;;  %vm365_vm7 = vcmp.eq.s32.totalorder %v803_v62, 2  ;;  %vm375_vm8 = vcmp.eq.s32.totalorder %v803_v62, 3 }
  0xe9   :  { %v232_v26 = vadd.f32 %v230_v18, %v217_v21  ;;  %vm219_vm9 = vcmp.eq.s32.totalorder %v793_v54, 7  ;;  %vm234_vm10 = vcmp.eq.s32.totalorder %v793_v54, 8  ;;  %v371_v33 = vsel %vm365_vm7, %v789_v50, 0.0  ;;  %v65_v21 = vld [vmem:[#allocation7 + $0x8] sm:$0xff] }
  0xea   :  { %vm107_vm11 = vcmp.ne.s32.totalorder %v793_v54, 10  ;;  %v201_v35 = vadd.f32 %v199_v27, %v186_v30  ;;  %vm249_vm12 = vcmp.eq.s32.totalorder %v793_v54, 9  ;;  %v373_v36 = vadd.f32 %v371_v33, %v363_v31 }
  0xeb   :  { %v247_v32 = vadd.f32 %v245_v19, %v232_v26  ;;  %vm385_vm13 = vcmp.eq.s32.totalorder %v803_v62, 4  ;;  %v214_v38 = vsel %vm204_vm4, %v815_v6, 0.0  ;;  %v381_v39 = vsel %vm375_vm8, %v796_v56, 0.0 }
  0xec   :  { %vm395_vm14 = vcmp.eq.s32.totalorder %v803_v62, 5  ;;  %v216_v40 = vadd.f32 %v214_v38, %v201_v35  ;;  %v229_v42 = vsel %vm219_vm9, %v819_v7, 0.0  ;;  %v383_v43 = vadd.f32 %v381_v39, %v373_v36  ;;  %v508_v38 = vld [vmem:[#allocation2 + $0x8] sm:$0x3]  ;;  %v507_v39 = vld [vmem:[#allocation2] sm:$0xff] }
  0xed   :  { %v262_v37 = vadd.f32 %v260_v22, %v247_v32  ;;  %vm405_vm15 = vcmp.eq.s32.totalorder %v803_v62, 6  ;;  %v244_v46 = vsel %vm234_vm10, %v825_v10, 0.0  ;;  %v259_v47 = vsel %vm249_vm12, %v830_v13, 0.0 }
  0xee   :  { %v391_v48 = vsel %vm385_vm13, %v800_v60, 0.0  ;;  %v231_v49 = vadd.f32 %v229_v42, %v216_v40  ;;  %v401_v52 = vsel %vm395_vm14, %v811_v3, 0.0  ;;  %vm415_vm0 = vcmp.eq.s32.totalorder %v803_v62, 7 }
  0xef   :  { %v264_v44 = vsub.f32 %v63_v34, %v262_v37  ;;  %v393_v51 = vadd.f32 %v391_v48, %v383_v43  ;;  %v411_v55 = vsel %vm405_vm15, %v815_v6, 0.0  ;;  %vm344_vm1 = vcmp.eq.s32.totalorder %v805_v63, 0 }
  0xf0   :  { %vm354_vm2 = vcmp.eq.s32.totalorder %v805_v63, 1  ;;  %v246_v57 = vadd.f32 %v244_v46, %v231_v49  ;;  %v350_v59 = vsel %vm344_vm1, %v782_v41, 0.0  ;;  %vm364_vm3 = vcmp.eq.s32.totalorder %v805_v63, 2 }
  0xf1   :  { %v874_v53 = vmul.f32 %v808_v1, %v264_v44  ;;  %v403_v58 = vadd.f32 %v401_v52, %v393_v51  ;;  %v360_v61 = vsel %vm354_vm2, %v784_v45, 0.0  ;;  %vm374_vm4 = vcmp.eq.s32.totalorder %v805_v63, 3 }
  0xf2   :  { %v362_v5 = vadd.f32 %v360_v61, %v350_v59  ;;  %v261_v8 = vadd.f32 %v259_v47, %v246_v57  ;;  %vm425_vm5 = vcmp.eq.s32.totalorder %v803_v62, 8  ;;  %v370_v11 = vsel %vm364_vm3, %v789_v50, 0.0 }
  0xf3   :  { %v268_v2 = vmul.f32 %v874_v53, %v874_v53  ;;  %v413_v9 = vadd.f32 %v411_v55, %v403_v58  ;;  %v421_v41 = vsel %vm415_vm0, %v819_v7, 0.0  ;;  %vm384_vm6 = vcmp.eq.s32.totalorder %v805_v63, 4 }
  0xf4   :  { %v372_v45 = vadd.f32 %v370_v11, %v362_v5  ;;  %v263_v12 = vsub.f32 %v62_v4, %v261_v8  ;;  %vm435_vm7 = vcmp.eq.s32.totalorder %v803_v62, 9  ;;  %v380_v15 = vsel %vm374_vm4, %v796_v56, 0.0 }
  0xf5   :  { %271 = vadd.xlane.f32.xlu1 %v268_v2  ;;  %v423_v14 = vadd.f32 %v421_v41, %v413_v9  ;;  %v565_v16 = vsel %vm107_vm11, 1.0, %v690_v0  ;;  %v431_v50 = vsel %vm425_vm5, %v825_v10, 0.0  ;;  %vm394_vm8 = vcmp.eq.s32.totalorder %v805_v63, 5 }
  0xf6   :  { %v382_v17 = vadd.f32 %v380_v15, %v372_v45  ;;  %v898_v18 = vmul.f32 %v565_v16, %v263_v12  ;;  %v390_v20 = vsel %vm384_vm6, %v800_v60, 0.0  ;;  %v441_v22 = vsel %vm435_vm7, %v830_v13, 0.0 }
  0xf7   :  { %v433_v19 = vadd.f32 %v431_v50, %v423_v14  ;;  %vm404_vm9 = vcmp.eq.s32.totalorder %v805_v63, 6  ;;  %vm339_vm10 = vcmp.ne.s32.totalorder %v803_v62, 10  ;;  %v400_v24 = vsel %vm394_vm8, %v811_v3, 0.0 }
  0xf8   :  { %v392_v23 = vadd.f32 %v390_v20, %v382_v17  ;;  %v267_v54 = vmul.f32 %v898_v18, %v898_v18  ;;  %vm414_vm11 = vcmp.eq.s32.totalorder %v805_v63, 7  ;;  %v410_v60 = vsel %vm404_vm9, %v815_v6, 0.0  ;;  %v64_v6 = vld [vmem:[#allocation7] sm:$0xff] }
  0xf9   :  { %v443_v56 = vadd.f32 %v441_v22, %v433_v19  ;;  %v579_v27 = vsel %vm339_vm10, 1.0, %v690_v0  ;;  %vm424_vm12 = vcmp.eq.s32.totalorder %v805_v63, 8  ;;  %v420_v30 = vsel %vm414_vm11, %v819_v7, 0.0 }
  0xfa   :  { %v402_v25 = vadd.f32 %v400_v24, %v392_v23  ;;  %269 = vadd.xlane.f32.xlu0 %v267_v54  ;;  %vm434_vm13 = vcmp.eq.s32.totalorder %v805_v63, 9  ;;  %v430_v31 = vsel %vm424_vm12, %v825_v10, 0.0  ;;  %vm338_vm14 = vcmp.ne.s32.totalorder %v805_v63, 10 }
  0xfb   :  { %v445_v26 = vsub.f32 %v65_v21, %v443_v56  ;;  %v440_v33 = vsel %vm434_vm13, %v830_v13, 0.0  ;;  %v578_v36 = vsel %vm338_vm14, 1.0, %v690_v0  ;;  %vm509_vm15 = vcmask 1041408  }
  0xfc   :  { %v412_v28 = vadd.f32 %v410_v60, %v402_v25  ;;  %v510_v40 = vsel %vm509_vm15, %v508_v38, 0.0  ;;  %v274_v10 = vsub.f32 1.0, %v808_v1  ;;  %v273_v63 = vsub.f32 1.0, %v565_v16 }
  0xfd   :  { %v911_v29 = vmul.f32 %v579_v27, %v445_v26  ;;  %v511_v43 = vadd.f32 %v510_v40, %v507_v39  ;;  %v455_v51 = vsub.f32 1.0, %v579_v27  ;;  %vm285_vm0 = vcmask 7168  }
  0xfe   :  { %v422_v62 = vadd.f32 %v420_v30, %v412_v28  ;;  %v454_v4 = vsub.f32 1.0, %v578_v36  ;;  %vm492_vm1 = vcmask 1040384  }
  0xff   :  { %v449_v3 = vmul.f32 %v911_v29, %v911_v29  ;;  %v512_v46 = vrot.slane %v511_v43, 4 }
 0x100   :  { %v432_v32 = vadd.f32 %v430_v31, %v422_v62 }
 0x101   :  { %452 = vadd.xlane.f32.xlu1 %v449_v3  ;;  %v513_v0 = vadd.f32 %v512_v46, %v511_v43 }
 0x102   :  { %v442_v34 = vadd.f32 %v440_v33, %v432_v32 }
 0x103   :  { %v514_v52 = vrot.slane %v513_v0, 2 }
 0x104   :  { %v444_v35 = vsub.f32 %v64_v6, %v442_v34 }
 0x105   :  { %v515_v59 = vadd.f32 %v514_v52, %v513_v0 }
 0x106   :  { %v446_v7 = vmul.f32 %v578_v36, %v444_v35 }
 0x107   :  { %v516_v2 = vrot.slane %v515_v59, 1 }
 0x108   :  { %v448_v37 = vmul.f32 %v446_v7, %v446_v7 }
 0x109   :  { %v517_v14 = vadd.f32 %v516_v2, %v515_v59 }
 0x10a   :  { %450 = vadd.xlane.f32.xlu0 %v448_v37 }
 0x10b   :  { %v519_v19 = vmul.f32 0.1, %v517_v14 }
 0x10d   :  { %v521_v21 = vsub.f32 %v508_v38, %v519_v19  ;;  %v520_v23 = vsub.f32 %v507_v39, %v519_v19 }
 0x10f   :  { %v523_v54 = vmul.f32 %v521_v21, %v521_v21  ;;  %v522_v27 = vmul.f32 %v520_v23, %v520_v23 }
 0x111   :  { %v524_v30 = vsel %vm509_vm15, %v523_v54, 0.0 }
 0x112   :  { %v525_v6 = vadd.f32 %v524_v30, %v522_v27 }
 0x182   :  { %v272_v42 = vpop.xlane.xlu1 %271 }
 0x183   :  { %v276_v44 = vadd.f32 %v274_v10, %v272_v42 }
 0x185   :  { %v278_v13 = vadd.f32 1e-12, %v276_v44 }
 0x187   :  { %595 = vrsqrt.f32 %v278_v13  ;;  %v270_v47 = vpop.xlane.xlu0 %269 }
 0x188   :  { %v275_v48 = vadd.f32 %v273_v63, %v270_v47 }
 0x18a   :  { %v277_v49 = vadd.f32 1e-12, %v275_v48 }
 0x18c   :  { %597 = vrsqrt.f32 %v277_v49 }
 0x18e   :  { %v453_v55 = vpop.xlane.xlu1 %452 }
 0x18f   :  { %v457_v57 = vadd.f32 %v455_v51, %v453_v55 }
 0x191   :  { %v596_v58 = vpop.eup %595  ;;  %v459_v61 = vadd.f32 1e-12, %v457_v57 }
 0x192   :  { %v282_v1 = vmul.f32 %v596_v58, %v272_v42  ;;  %v284_v5 = vmul.f32 %v596_v58, %v874_v53 }
 0x193   :  { %599 = vrsqrt.f32 %v459_v61 }
 0x194   :  { %v287_v45 = vsel %vm285_vm0, %v282_v1, 0.0 }
 0x196   :  { %v598_v8 = vpop.eup %597 }
 0x197   :  { %v451_v9 = vpop.xlane.xlu0 %450  ;;  %v281_v11 = vmul.f32 %v598_v8, %v270_v47  ;;  %v283_v12 = vmul.f32 %v598_v8, %v898_v18 }
 0x198   :  { %v456_v41 = vadd.f32 %v454_v4, %v451_v9 }
 0x199   :  { %v286_v16 = vsel %vm285_vm0, %v281_v11, 0.0  ;;  %v298_v50 = vadd.f32 %v284_v5, %v283_v12 }
 0x19a   :  { %v458_v15 = vadd.f32 1e-12, %v456_v41  ;;  %v288_v17 = vadd.f32 %v287_v45, %v286_v16 }
 0x19b   :  { %v299_v53 = vrot.slane %v298_v50, 4 }
 0x19c   :  { %601 = vrsqrt.f32 %v458_v15  ;;  %289 = vadd.xlane.f32.xlu0 %v288_v17 }
 0x19d   :  { %v600_v20 = vpop.eup %599  ;;  %v300_v56 = vadd.f32 %v299_v53, %v298_v50 }
 0x19e   :  { %v463_v22 = vmul.f32 %v600_v20, %v453_v55  ;;  %v465_v24 = vmul.f32 %v600_v20, %v911_v29 }
 0x19f   :  { %v301_v62 = vrot.slane %v300_v56, 2 }
 0x1a0   :  { %v467_v26 = vsel %vm285_vm0, %v463_v22, 0.0 }
 0x1a1   :  { %v302_v33 = vadd.f32 %v301_v62, %v300_v56 }
 0x1a3   :  { %v303_v29 = vrot.slane %v302_v33, 1 }
 0x1a5   :  { %v304_v38 = vadd.f32 %v303_v29, %v302_v33 }
 0x1a6   :  { %v602_v25 = vpop.eup %601 }
 0x1a7   :  { %v462_v18 = vmul.f32 %v602_v25, %v451_v9  ;;  %v464_v60 = vmul.f32 %v602_v25, %v446_v7 }
 0x1a9   :  { %v466_v28 = vsel %vm285_vm0, %v462_v18, 0.0  ;;  %v478_v3 = vadd.f32 %v465_v24, %v464_v60 }
 0x1aa   :  { %v468_v31 = vadd.f32 %v467_v26, %v466_v28 }
 0x1ab   :  { %v479_v32 = vrot.slane %v478_v3, 4 }
 0x1ac   :  { %469 = vadd.xlane.f32.xlu1 %v468_v31 }
 0x1ad   :  { %v480_v34 = vadd.f32 %v479_v32, %v478_v3 }
 0x1af   :  { %v481_v35 = vrot.slane %v480_v34, 2 }
 0x1b0   :  { %526 = vadd.xlane.f32.xlu1 %v525_v6 }
 0x1b1   :  { %v482_v36 = vadd.f32 %v481_v35, %v480_v34 }
 0x1b3   :  { %v483_v37 = vrot.slane %v482_v36, 1 }
 0x1b5   :  { %v484_v7 = vadd.f32 %v483_v37, %v482_v36 }
 0x1b7   :  { %v490_v39 = vadd.f32 %v484_v7, %v304_v38 }
 0x1b9   :  { %v491_v40 = vmul.f32 %v490_v39, %v490_v39 }
 0x1bb   :  { %v493_v10 = vsel %vm492_vm1, %v491_v40, 0.0 }
 0x1bc   :  { %494 = vadd.xlane.f32.xlu0 %v493_v10 }
 0x229   :  { %v290_v42 = vpop.xlane.xlu0 %289 }
 0x22a   :  { %v291_v43 = vrot.slane %v290_v42, 4 }
 0x22c   :  { %v292_v44 = vadd.f32 %v291_v43, %v290_v42 }
 0x22e   :  { %v293_v13 = vrot.slane %v292_v44, 2 }
 0x230   :  { %v294_v46 = vadd.f32 %v293_v13, %v292_v44 }
 0x232   :  { %v295_v63 = vrot.slane %v294_v46, 1 }
 0x234   :  { %v296_v47 = vadd.f32 %v295_v63, %v294_v46 }
 0x236   :  { %580 = vpush %v296_v47 }
 0x239   :  { %v470_v48 = vpop.xlane.xlu1 %469 }
 0x23a   :  { %v471_v0 = vrot.slane %v470_v48, 4 }
 0x23c   :  { %v472_v49 = vadd.f32 %v471_v0, %v470_v48 }
 0x23d   :  { %v527_v52 = vpop.xlane.xlu1 %526 }
 0x23e   :  { %v473_v51 = vrot.slane %v472_v49, 2  ;;  %v528_v57 = vrot.slane %v527_v52, 4 }
 0x240   :  { %v474_v55 = vadd.f32 %v473_v51, %v472_v49  ;;  %v529_v61 = vadd.f32 %v528_v57, %v527_v52 }
 0x242   :  { %v475_v58 = vrot.slane %v474_v55, 1  ;;  %v530_v1 = vrot.slane %v529_v61, 2 }
 0x244   :  { %v476_v59 = vadd.f32 %v475_v58, %v474_v55  ;;  %v531_v8 = vadd.f32 %v530_v1, %v529_v61 }
 0x246   :  { %582 = vpush %v476_v59  ;;  %v532_v41 = vrot.slane %v531_v8, 1 }
 0x248   :  { %v533_v14 = vadd.f32 %v532_v41, %v531_v8 }
 0x249   :  { %v495_v2 = vpop.xlane.xlu0 %494 }
 0x24a   :  { %v496_v4 = vrot.slane %v495_v2, 4 }
 0x24c   :  { %v497_v5 = vadd.f32 %v496_v4, %v495_v2 }
 0x24e   :  { %v498_v9 = vrot.slane %v497_v5, 2 }
 0x250   :  { %v499_v11 = vadd.f32 %v498_v9, %v497_v5 }
 0x252   :  { %v500_v45 = vrot.slane %v499_v11, 1 }
 0x254   :  { %v501_v12 = vadd.f32 %v500_v45, %v499_v11 }
 0x256   :  { %584 = vpush %v501_v12 }
 0x257   :  { %586 = vpush %v533_v14 }
 0x267   :  { %s581_s1 = spop %580 }
 0x277   :  { %s583_s2 = spop %582 }
 0x278   :  { %s485_s4 = sadd.f32 %s583_s2, %s581_s1 }
 0x27a   :  { %s488_s30 = smul.f32 0.005, %s485_s4 }
 0x27c   :  { %s489_s6 = smul.f32 10.0, %s488_s30 }
 0x27e   :  { %544 = sst [smem:[#allocation8]] %s489_s6 }
 0x287   :  { %s585_s10 = spop %584 }
 0x288   :  { %s505_s11 = smul.f32 0.0625, %s585_s10  ;;  %s587_s12 = spop %586 }
 0x289   :  { %s535_s13 = smul.f32 10.0, %s587_s12 }
 0x28a   :  { %s506_s14 = smul.f32 3.0, %s505_s11 }
 0x28b   :  { %s536_s15 = smul.f32 -0.1, %s535_s13 }
 0x28c   :  { %546 = sst [smem:[#allocation8 + $0x1]] %s506_s14 }
 0x28d   :  { %s539_s16 = smul.f32 0.0625, %s536_s15 }
 0x28f   :  { %s542_s3 = smul.f32 0.14285715, %s539_s16 }
 0x291   :  { %548 = sst [smem:[#allocation8 + $0x2]] %s542_s3 }
 0x292   :  { %678 = shalt.err (!%p675_p12)
}
 0x293   :  { %s691_s25 = smov [#allocation8]  }
 0x294   :  { %556 = dma.smem_to_hbm %s691_s25, 16, %s948_s5, [#allocation4]  }
 0x295   :  { %683 = dma.done.wait [#allocation4], 16  }
 0x296   :  { %684 = vsyncadd [#allocation4], 4294967280 }
 0x297   :  { %560 = sfence }
 0x298   :  { %561 = vsyncpa [#allocation3], 1 }
 0x299   :  { %562 = vsyncpa [#allocation6], 1 }
 0x29a   :  { %563 = vsyncpa [#allocation4], 1 }

</bundles_post_ra>
